<compile_context>
chip_gen: v5e
topology: v5e:2x2
jax: 0.10.0
libtpu: 0.0.40
codegen_flags: <defaults>
</compile_context>

<pallas_src>
import functools

import jax
import jax.numpy as jnp
from jax.experimental import pallas as pl
from jax.experimental.pallas import tpu as pltpu

IN_FEATURES = 22
HIDDEN = 10


def _round_up(n, m):
    return ((n + m - 1) // m) * m


def _mxu_pack_factor():
    """Batch rows packed per MXU pass.

    11 * 22 = 242 <= 256 (v6e / v7x 256-wide MXU); 5 * 22 = 110 <= 128
    (v2-v5 128-wide MXU).  Falls back to the conservative value.
    """
    try:
        kind = jax.devices()[0].device_kind.lower()
    except Exception:
        return 5
    return 11 if ("v6" in kind or "v7" in kind) else 5


def _block_diag(w, r):
    """(K, N) -> (r*K, r*N) block-diagonal replication of w."""
    k, n = w.shape
    eye = jnp.eye(r, dtype=w.dtype)
    return (eye[:, None, :, None] * w[None, :, None, :]).reshape(r * k, r * n)


def _classifier_kernel(xp_ref, w1_ref, b1_ref, w2_ref, b2_ref, o_ref):
    # xp_ref: (tbp, r*22)   packed input tile (r batch rows per packed row)
    # w1_ref: (r*22, r*10)  block-diagonal fc1 weight (bf16, VMEM-resident)
    # b1_ref: (1, r*10)     fc1 bias tiled r times (f32, VMEM-resident)
    # w2_ref: (r*10, r)     block-diagonal fc2 weight (f32, VMEM-resident)
    # b2_ref: (1,)          fc2 bias scalar (f32, SMEM)
    # o_ref : (tbp, r)      output tile; unpacked to (B, 1) in the wrapper
    xb = xp_ref[...].astype(jnp.bfloat16)   # in-kernel cast: no extra HBM pass
    h = jnp.dot(xb, w1_ref[...], preferred_element_type=jnp.float32)
    h = jnp.maximum(h + b1_ref[...], 0.0)
    z = jnp.dot(h, w2_ref[...], preferred_element_type=jnp.float32) + b2_ref[0]
    # log_softmax along dim=1 of a single-class tensor: result is exactly
    # z - z -> 0.0 for finite rows, NaN-propagating for non-finite rows,
    # matching F.log_softmax.  Float x - x is NOT folded to 0 by the compiler.
    o_ref[...] = z - z


@functools.partial(jax.jit, static_argnames=("r", "block_packed_rows"))
def _forward_impl(x, w1, b1, w2, b2, *, r, block_packed_rows):
    B = x.shape[0]
    xf = x.reshape(B, -1)                       # mirrors x.view(x.shape[0], -1)
    assert xf.shape[1] == IN_FEATURES, (
        f"expected {IN_FEATURES} flattened features, got {xf.shape[1]}")
    if not jnp.issubdtype(xf.dtype, jnp.floating):
        xf = xf.astype(jnp.float32)

    # Pad the batch only to a multiple of r (a handful of rows, and only when
    # B % r != 0) so the row-packing reshape below is legal.  No full-tile pad.
    Bp = _round_up(B, r)
    if Bp != B:
        xf = jnp.pad(xf, ((0, Bp - B), (0, 0)))
    Np = Bp // r
    # Metadata-only reshape (row-major): r consecutive batch rows per packed row.
    xp = xf.reshape(Np, r * IN_FEATURES)

    # Block-diagonal weights: one MXU pass handles r batch rows at once, and
    # the block-diagonal structure keeps each packed column (= original batch
    # row) independent of its neighbours, so pad columns never contaminate
    # real outputs.  These are tiny (<= 242x110) and VMEM-resident.
    w1_bd = _block_diag(w1.astype(jnp.bfloat16), r)                    # (r*22, r*10)
    w2_bd = _block_diag(w2.T.astype(jnp.float32), r)                   # (r*10, r)
    b1_t = jnp.tile(b1.reshape(1, HIDDEN).astype(jnp.float32), (1, r))  # (1, r*10)
    b2_s = b2.reshape(1).astype(jnp.float32)                           # (1,) -> SMEM

    # Packed-row tile: multiple of 8 sublanes; capped so the double-buffered
    # VMEM footprint stays well under v7x's 64 MiB; split into >= 2 grid steps
    # when possible so the "parallel" axis can shard over v7x's 2 TensorCores.
    if Np <= 8:
        tbp = Np                                 # block == full dim (always legal)
    else:
        tbp = min(block_packed_rows, _round_up(Np, 8))
        if Np >= 16:
            tbp = min(tbp, _round_up(pl.cdiv(Np, 2), 8))
        tbp = max(8, (tbp // 8) * 8)
        tbp = min(tbp, 8192)                     # hard VMEM-safety cap
    grid = (pl.cdiv(Np, tbp),)

    out = pl.pallas_call(
        _classifier_kernel,
        out_shape=jax.ShapeDtypeStruct((Np, r), jnp.float32),
        grid_spec=pltpu.PrefetchScalarGridSpec(
            num_scalar_prefetch=0,
            grid=grid,
            in_specs=[
                pl.BlockSpec((tbp, r * IN_FEATURES), lambda i: (i, 0)),       # x (streamed)
                pl.BlockSpec((r * IN_FEATURES, r * HIDDEN), lambda i: (0, 0)),  # W1 bd (resident)
                pl.BlockSpec((1, r * HIDDEN), lambda i: (0, 0)),              # b1 tiled (resident)
                pl.BlockSpec((r * HIDDEN, r), lambda i: (0, 0)),              # W2 bd (resident)
                pl.BlockSpec(memory_space=pltpu.MemorySpace.SMEM),            # b2 scalar
            ],
            out_specs=pl.BlockSpec((tbp, r), lambda i: (i, 0)),
        ),
        compiler_params=pltpu.CompilerParams(
            dimension_semantics=("parallel",),    # megacore sharding on v7x
            vmem_limit_bytes=48 * 1024 * 1024,    # > worst-case footprint, < v7x 64 MiB
        ),
    )(xp, w1_bd, b1_t, w2_bd, b2_s)

    # (Np, r) -> (Bp, 1) is another metadata-only row-major reshape; slice off
    # the (finite-valued, zero-padded) tail rows.
    return out.reshape(Bp, 1)[:B]


def classifier_forward(x, w1, b1, w2, b2, *, block_packed_rows=4096, r=None):
    """x: (B, ...) with 22 flattened features; returns (B, 1) float32."""
    if r is None:
        r = _mxu_pack_factor()
    return _forward_impl(x, w1, b1, w2, b2, r=r, block_packed_rows=block_packed_rows)


def init_params(key):
    """Deterministic init matching nn.Linear's U(-1/sqrt(in), 1/sqrt(in))."""
    k1, k2, k3, k4 = jax.random.split(key, 4)
    bound1 = 1.0 / jnp.sqrt(22.0)
    bound2 = 1.0 / jnp.sqrt(10.0)
    w1 = jax.random.uniform(k1, (IN_FEATURES, HIDDEN), jnp.float32, -bound1, bound1)  # fc1.weight.T
    b1 = jax.random.uniform(k2, (1, HIDDEN), jnp.float32, -bound1, bound1)
    w2 = jax.random.uniform(k3, (1, HIDDEN), jnp.float32, -bound2, bound2)            # fc2.weight
    b2 = jax.random.uniform(k4, (1,), jnp.float32, -bound2, bound2)
    return w1, b1, w2, b2


def _reference(x, w1, b1, w2, b2):
    xf = x.reshape(x.shape[0], -1)
    h = jnp.maximum(xf @ w1 + b1, 0.0)
    z = h @ w2.T + b2
    return jax.nn.log_softmax(z, axis=1)


if __name__ == "__main__":
    key = jax.random.PRNGKey(0)
    kp, kx1, kx2 = jax.random.split(key, 3)
    w1, b1, w2, b2 = init_params(kp)

    # Small batch, features already flat: (2, 22).  Single (partial) grid step.
    x1 = jax.random.normal(kx1, (2, IN_FEATURES), jnp.float32)
    out1 = jax.block_until_ready(classifier_forward(x1, w1, b1, w2, b2))
    ref1 = _reference(x1, w1, b1, w2, b2)
    assert out1.shape == (2, 1)
    assert jnp.allclose(out1, ref1, atol=1e-6), (out1, ref1)

    # Larger batch with a trailing shape that needs flattening: (300, 2, 11).
    # Small tile forces a multi-step grid with a ragged last block.
    x2 = jax.random.normal(kx2, (300, 2, 11), jnp.float32)
    out2 = jax.block_until_ready(
        classifier_forward(x2, w1, b1, w2, b2, block_packed_rows=16))
    ref2 = _reference(x2, w1, b1, w2, b2)
    assert out2.shape == (300, 1)
    assert jnp.allclose(out2, ref2, atol=1e-6), (out2, ref2)

    print("KERNEL_OK")
</pallas_src>

<mosaic_0001>
module attributes {stable_mosaic.version = 11 : i64} {
  func.func @_classifier_kernel(%arg0: i32, %arg1: memref<1x110xf32, #tpu.memory_space<vmem>>, %arg2: memref<110x50xbf16, #tpu.memory_space<vmem>>, %arg3: memref<1x50xf32, #tpu.memory_space<vmem>>, %arg4: memref<50x5xf32, #tpu.memory_space<vmem>>, %arg5: memref<1xf32, #tpu.memory_space<smem>>, %arg6: memref<1x5xf32, #tpu.memory_space<vmem>>) attributes {dimension_semantics = [#tpu.dimension_semantics<parallel>], iteration_bounds = array<i64: 1>, scalar_prefetch = 0 : i64, scratch_operands = 0 : i64, tpu.core_type = #tpu.core_type<tc>, window_params = [{transform_indices = @transform_0, window_bounds = array<i64: 1, 110>}, {pipeline_mode = #tpu.pipeline_mode<synchronous>, transform_indices = @transform_1, window_bounds = array<i64: 110, 50>}, {pipeline_mode = #tpu.pipeline_mode<synchronous>, transform_indices = @transform_2, window_bounds = array<i64: 1, 50>}, {pipeline_mode = #tpu.pipeline_mode<synchronous>, transform_indices = @transform_3, window_bounds = array<i64: 50, 5>}, {transform_indices = @transform_4, window_bounds = array<i64: 1>}, {transform_indices = @transform_5, window_bounds = array<i64: 1, 5>}]} {
    %c0 = arith.constant 0 : index
    %c0_0 = arith.constant 0 : index
    %0 = vector.load %arg1[%c0, %c0_0] : memref<1x110xf32, #tpu.memory_space<vmem>>, vector<1x110xf32>
    %1 = arith.truncf %0 : vector<1x110xf32> to vector<1x110xbf16>
    %c0_1 = arith.constant 0 : index
    %c0_2 = arith.constant 0 : index
    %2 = vector.load %arg2[%c0_1, %c0_2] : memref<110x50xbf16, #tpu.memory_space<vmem>>, vector<110x50xbf16>
    %cst = arith.constant dense<0.000000e+00> : vector<1x50xf32>
    %3 = tpu.matmul %1, %2, %cst {dimension_numbers = #tpu.dot_dimension_numbers<[1], [0], [0], [1], [0, 0, 1, 1], [], []>} : vector<1x110xbf16>, vector<110x50xbf16>, vector<1x50xf32> -> vector<1x50xf32>
    %c0_3 = arith.constant 0 : index
    %c0_4 = arith.constant 0 : index
    %4 = vector.load %arg3[%c0_3, %c0_4] : memref<1x50xf32, #tpu.memory_space<vmem>>, vector<1x50xf32>
    %5 = arith.addf %3, %4 : vector<1x50xf32>
    %cst_5 = arith.constant 0.000000e+00 : f32
    %6 = vector.broadcast %cst_5 : f32 to vector<1x50xf32>
    %7 = arith.maximumf %5, %6 : vector<1x50xf32>
    %c0_6 = arith.constant 0 : index
    %c0_7 = arith.constant 0 : index
    %8 = vector.load %arg4[%c0_6, %c0_7] : memref<50x5xf32, #tpu.memory_space<vmem>>, vector<50x5xf32>
    %cst_8 = arith.constant dense<0.000000e+00> : vector<1x5xf32>
    %9 = tpu.matmul %7, %8, %cst_8 {dimension_numbers = #tpu.dot_dimension_numbers<[1], [0], [0], [1], [0, 0, 1, 1], [], []>} : vector<1x50xf32>, vector<50x5xf32>, vector<1x5xf32> -> vector<1x5xf32>
    %c0_9 = arith.constant 0 : index
    %10 = memref.load %arg5[%c0_9] : memref<1xf32, #tpu.memory_space<smem>>
    %11 = vector.broadcast %10 : f32 to vector<1x5xf32>
    %12 = arith.addf %9, %11 : vector<1x5xf32>
    %13 = arith.subf %12, %12 : vector<1x5xf32>
    %c0_10 = arith.constant 0 : index
    %c0_11 = arith.constant 0 : index
    %14 = vector.load %arg6[%c0_10, %c0_11] : memref<1x5xf32, #tpu.memory_space<vmem>>, vector<1x5xf32>
    tpu.vector_store %arg6[%c0_10, %c0_11], %13 {strides = array<i32>} : memref<1x5xf32, #tpu.memory_space<vmem>>, vector<1x5xf32>,
    return
  }
  func.func @transform_0(%arg0: i32) -> (i32, i32) {
    %c0_i32 = arith.constant 0 : i32
    %c0_i32_0 = arith.constant 0 : i32
    return %arg0, %c0_i32 : i32, i32
  }
  func.func @transform_1(%arg0: i32) -> (i32, i32) {
    %c0_i32 = arith.constant 0 : i32
    %c0_i32_0 = arith.constant 0 : i32
    %c0_i32_1 = arith.constant 0 : i32
    return %c0_i32, %c0_i32_0 : i32, i32
  }
  func.func @transform_2(%arg0: i32) -> (i32, i32) {
    %c0_i32 = arith.constant 0 : i32
    %c0_i32_0 = arith.constant 0 : i32
    %c0_i32_1 = arith.constant 0 : i32
    return %c0_i32, %c0_i32_0 : i32, i32
  }
  func.func @transform_3(%arg0: i32) -> (i32, i32) {
    %c0_i32 = arith.constant 0 : i32
    %c0_i32_0 = arith.constant 0 : i32
    %c0_i32_1 = arith.constant 0 : i32
    return %c0_i32, %c0_i32_0 : i32, i32
  }
  func.func @transform_4(%arg0: i32) -> i32 {
    %c0_i32 = arith.constant 0 : i32
    %c0_i32_0 = arith.constant 0 : i32
    return %c0_i32 : i32
  }
  func.func @transform_5(%arg0: i32) -> (i32, i32) {
    %c0_i32 = arith.constant 0 : i32
    %c0_i32_0 = arith.constant 0 : i32
    return %arg0, %c0_i32 : i32, i32
  }
}

</mosaic_0001>

<bundles_post_ra>
// kernel: _forward_impl.1
= control target key start
LH: loop header
LB: loop body
LE: loop exit
PB: predicated region body
PF: predicated region fallthrough
CT: control target
= control target key end

     0   :  { %vm84_vm0 = vcmask 1046528   ;;  %vm115_vm1 = vcmask 1041408   ;;  %vm80_vm2 = vcmask 900096   ;;  %vm111_vm3 = vcmask 408576   ;;  %s271_s1 = inlined_call_operand.vmem [shape: bf16[110,50], index: 1, kind: input, shape index: {}]   ;;  %s272_s3 = inlined_call_operand.vmem [shape: f32[50,5], index: 3, kind: input, shape index: {}]   ;;  %s273_s0 = inlined_call_operand.vmem [shape: f32[1,110], index: 0, kind: input, shape index: {}]   ;;  %s274_s2 = inlined_call_operand.vmem [shape: f32[1,50], index: 2, kind: input, shape index: {}]   ;;  %s275_s4 = inlined_call_operand.<no memory space> [shape: f32[1], index: 4, kind: input, shape index: {}]   ;;  %s276_s5 = inlined_call_operand.vmem [shape: f32[1,5], index: 5, kind: output, shape index: {}]  }
   0x1   :  { %v172_v0 = vld [vmem:[%s271_s1 + $0x30] sm:$0xf]  ;;  %v183_v1 = vld [vmem:[%s271_s1 + $0x30] sm:$0x70]  ;;  %v107_v5 = vld [vmem:[%s272_s3 + $0x28] sm:$0xff]  ;;  %v110_v24 = vstv %s275_s4  ;;  %vm140_vm4 = vcmask 32768  }
   0x2   :  { %v173_v2 = vor.u32 %v183_v1, %v172_v0  ;;  %v108_v4 = vld [vmem:[%s272_s3 + $0x30] sm:$0x3]  ;;  %v182_v6 = vld [vmem:[%s271_s1 + $0x28] sm:$0xff]  ;;  %v106_v7 = vld [vmem:[%s272_s3 + $0x20] sm:$0xff] }
   0x3   :  { %175 = vmatpush.msk.msra.mxu1 %vm115_vm1, %v108_v4  ;;  %v105_v8 = vld [vmem:[%s272_s3 + $0x18] sm:$0xff]  ;;  %v181_v9 = vld [vmem:[%s271_s1 + $0x20] sm:$0xff]  ;;  %v179_v11 = vld [vmem:[%s271_s1 + $0x10] sm:$0xff] }
   0x4   :  { %v86_v3 = vsel %vm84_vm0, %v173_v2, 0  ;;  %v180_v10 = vld [vmem:[%s271_s1 + $0x18] sm:$0xff]  ;;  %v178_v12 = vld [vmem:[%s271_s1 + $0x8] sm:$0xff]  ;;  %v177_v13 = vld [vmem:[%s271_s1] sm:$0xff] }
   0x5   :  { %89 = vmatpush.bf16.msra.mxu0 %v86_v3  ;;  %129 = vmatpush.msra.mxu1 %v107_v5  ;;  %v22_v14 = vld [vmem:[%s273_s0] sm:$0x1]  ;;  %v104_v16 = vld [vmem:[%s272_s3 + $0x10] sm:$0xff]  ;;  %v103_v17 = vld [vmem:[%s272_s3 + $0x8] sm:$0xff] }
   0x6   :  { %v23_v15 = vpack.c.bf16 %v22_v14, %v22_v14  ;;  %v102_v18 = vld [vmem:[%s272_s3] sm:$0xff] }
   0x7   :  { %130 = vmatpush.msra.mxu1 %v106_v7  ;;  %v38_v19 = vld [vmem:[%s274_s2] sm:$0x1] }
   0x9   :  { %90 = vmatpush.bf16.msra.mxu0 %v182_v6  ;;  %131 = vmatpush.msra.mxu1 %v105_v8 }
   0xb   :  { %132 = vmatpush.msra.mxu1 %v104_v16 }
   0xd   :  { %91 = vmatpush.bf16.msra.mxu0 %v181_v9  ;;  %133 = vmatpush.msra.mxu1 %v103_v17 }
   0xf   :  { %134 = vmatpush.msra.mxu1 %v102_v18 }
  0x11   :  { %92 = vmatpush.bf16.msra.mxu0 %v180_v10 }
  0x15   :  { %93 = vmatpush.bf16.msra.mxu0 %v179_v11 }
  0x19   :  { %94 = vmatpush.bf16.msra.mxu0 %v178_v12 }
  0x1d   :  { %95 = vmatpush.bf16.msra.mxu0 %v177_v13 }
  0x20   :  { %174 = vmatmul.msk.bf16.vlgmr.msra.gmra.mxu0 %vm80_vm2, %v23_v15 }
  0x9d   :  { %v97_v20 = vpop.f32.mrf.mxu0 }
  0x9e   :  { %v98_v21 = vadd.f32 %v97_v20, %v38_v19 }
  0xa0   :  { %v101_v22 = vmax.f32 %v98_v21, 0.0 }
  0xa2   :  { %176 = vmatmul.msk.f32.vlgmr.msra.gmra.mxu1 %vm111_vm3, %v101_v22 }
  0xa5   :  { %v99_v23 = vpop.f32.mrf.mxu0 }
 0x11f   :  { %v136_v25 = vpop.f32.mrf.mxu1 }
 0x120   :  { %v137_v26 = vadd.f32 %v136_v25, %v110_v24 }
 0x122   :  { %v139_v27 = vsub.f32 %v137_v26, %v137_v26 }
 0x124   :  { %141 = vst.msk [vmem:[%s276_s5] sm:$0x1] %vm140_vm4, %v139_v27 }

</bundles_post_ra>
